<compile_context>
chip_gen: v6e
topology: v6e:2x2x1
jax: 0.10.0
libtpu: 0.0.40
codegen_flags: <defaults>
</compile_context>

<pallas_src>
import functools
import math

import jax
import jax.numpy as jnp
from jax.experimental import pallas as pl
from jax.experimental.pallas import tpu as pltpu


def _round_up(n, m):
    return (n + m - 1) // m * m


# ---------------------------------------------------------------------------
# Production path: out = FFN(x + LayerNorm(x))
# ---------------------------------------------------------------------------
def _ffn_kernel(x_ref, gamma_ref, beta_ref, w1_ref, b1_ref, w2_ref, b2_ref,
                out_ref, *, matmul_dtype):
    x = x_ref[...].astype(jnp.float32)                       # (TM, D)
    # LayerNorm + residual — all elementwise math in f32.
    mean = jnp.mean(x, axis=-1, keepdims=True)
    var = jnp.mean(jnp.square(x - mean), axis=-1, keepdims=True)
    xn = (x - mean) * jax.lax.rsqrt(var + 1e-5)
    y = x + xn * gamma_ref[...] + beta_ref[...]
    # FFN — MXU operands optionally bf16, accumulation f32.
    h1 = jnp.dot(y.astype(matmul_dtype), w1_ref[...],
                 preferred_element_type=jnp.float32) + b1_ref[...]
    h1 = jnp.maximum(h1, 0.0)
    out = jnp.dot(h1.astype(matmul_dtype), w2_ref[...],
                  preferred_element_type=jnp.float32) + b2_ref[...]
    out_ref[...] = out.astype(out_ref.dtype)


# ---------------------------------------------------------------------------
# Debug-only path: the nn.MultiheadAttention output (discarded by the module).
# One grid step per batch sample; heads handled as a leading batch axis.
# ---------------------------------------------------------------------------
def _attn_kernel(x_ref, wq_ref, wk_ref, wv_ref,
                 wiq_ref, wik_ref, wiv_ref,
                 biq_ref, bik_ref, biv_ref,
                 wo_ref, bo_ref, attn_ref, *, num_heads, head_dim):
    x = x_ref[...].astype(jnp.float32)                       # (S, D)
    seq = x.shape[0]
    n_h, hd = num_heads, head_dim

    def project(w_ref, wi_ref, bi_ref):
        # Chained projection (x @ W) @ Wi_head, kept in-kernel (no host fusion).
        t = jnp.dot(x, w_ref[...], preferred_element_type=jnp.float32)   # (S, D)
        tb = jnp.broadcast_to(t[None], (n_h, seq, t.shape[1]))           # (H, S, D)
        return jax.lax.dot_general(
            tb, wi_ref[...], (((2,), (1,)), ((0,), (0,))),
            preferred_element_type=jnp.float32) + bi_ref[...]            # (H, S, hd)

    q = project(wq_ref, wiq_ref, biq_ref)
    k = project(wk_ref, wik_ref, bik_ref)
    v = project(wv_ref, wiv_ref, biv_ref)

    s = jax.lax.dot_general(q, k, (((2,), (2,)), ((0,), (0,))),
                            preferred_element_type=jnp.float32)          # (H, S, S)
    s = s * (1.0 / math.sqrt(hd))
    m = jnp.max(s, axis=-1, keepdims=True)
    p = jnp.exp(s - m)
    p = p / jnp.sum(p, axis=-1, keepdims=True)                           # exact softmax
    ctx = jax.lax.dot_general(p, v, (((2,), (1,)), ((0,), (0,))),
                              preferred_element_type=jnp.float32)        # (H, S, hd)
    o = jax.lax.dot_general(ctx, wo_ref[...], (((2,), (1,)), ((0,), (0,))),
                            preferred_element_type=jnp.float32)          # (H, S, D)
    attn_ref[...] = (jnp.sum(o, axis=0) + bo_ref[...]).astype(attn_ref.dtype)


def _attention_debug(x, params, *, num_heads):
    B, S, D = x.shape
    H = num_heads
    hd = D // H
    # Head-major weight layout (cheap host-side reorg; debug path only).
    wiq_h = params["wiq"].reshape(D, H, hd).transpose(1, 0, 2)   # (H, D, hd)
    wik_h = params["wik"].reshape(D, H, hd).transpose(1, 0, 2)
    wiv_h = params["wiv"].reshape(D, H, hd).transpose(1, 0, 2)
    biq_h = params["biq"].reshape(1, H, hd).transpose(1, 0, 2)   # (H, 1, hd)
    bik_h = params["bik"].reshape(1, H, hd).transpose(1, 0, 2)
    biv_h = params["biv"].reshape(1, H, hd).transpose(1, 0, 2)
    wo_h = params["wo"].reshape(H, hd, D)                        # (H, hd, D)

    def pinned(shape):
        return pl.BlockSpec(shape, lambda b: (0,) * len(shape))

    kernel = functools.partial(_attn_kernel, num_heads=H, head_dim=hd)
    attn = pl.pallas_call(
        kernel,
        out_shape=jax.ShapeDtypeStruct((B, S, D), x.dtype),
        grid_spec=pltpu.PrefetchScalarGridSpec(
            num_scalar_prefetch=0,
            grid=(B,),
            in_specs=[pl.BlockSpec((None, S, D), lambda b: (b, 0, 0)),
                      pinned((D, D)), pinned((D, D)), pinned((D, D)),
                      pinned((H, D, hd)), pinned((H, D, hd)), pinned((H, D, hd)),
                      pinned((H, 1, hd)), pinned((H, 1, hd)), pinned((H, 1, hd)),
                      pinned((H, hd, D)), pinned((1, D))],
            out_specs=pl.BlockSpec((None, S, D), lambda b: (b, 0, 0))),
        compiler_params=pltpu.CompilerParams(
            dimension_semantics=("parallel",)),
    )(x, params["wq"], params["wk"], params["wv"],
      wiq_h, wik_h, wiv_h, biq_h, bik_h, biv_h, wo_h, params["bo"])
    return attn


def multi_head_attention_layer(x, params, *, num_heads,
                               matmul_dtype=jnp.float32, return_attn=False):
    """Forward pass of MultiHeadAttentionLayer (eval mode)."""
    B, S, D = x.shape
    Dff = params["w1"].shape[1]
    rows = B * S

    # --- choose a row tile that fits a v7x-safe VMEM activation budget ---
    rows8 = _round_up(rows, 8)
    per_row_bytes = 4 * (2 * D + Dff + D)          # x+out tiles, h1, y  (f32)
    tm = 256
    while tm > 8 and 2 * tm * per_row_bytes > (16 << 20):
        tm //= 2
    tm = min(tm, rows8)
    rows_pad = _round_up(rows, tm)                 # dense (unmasked) stores

    x2 = x.reshape(rows, D)
    if rows_pad != rows:
        x2 = jnp.pad(x2, ((0, rows_pad - rows), (0, 0)))

    # Weights cast host-side (halves weight HBM traffic / VMEM residency when
    # bf16); biases / LayerNorm params stay f32.
    w1 = params["w1"].astype(matmul_dtype)
    w2 = params["w2"].astype(matmul_dtype)

    w_itemsize = jnp.dtype(matmul_dtype).itemsize
    w_bytes = 2 * D * Dff * w_itemsize
    act_bytes = 2 * tm * per_row_bytes
    vmem_limit = int(min(max(w_bytes + act_bytes + (8 << 20), 32 << 20), 48 << 20))

    row_spec = pl.BlockSpec((tm, D), lambda i: (i, 0))

    def pinned(shape):
        return pl.BlockSpec(shape, lambda i: (0,) * len(shape))

    out = pl.pallas_call(
        functools.partial(_ffn_kernel, matmul_dtype=matmul_dtype),
        out_shape=jax.ShapeDtypeStruct((rows_pad, D), x.dtype),
        grid_spec=pltpu.PrefetchScalarGridSpec(
            num_scalar_prefetch=0,
            grid=(rows_pad // tm,),
            in_specs=[row_spec,
                      pinned((1, D)), pinned((1, D)),        # gamma, beta
                      pinned((D, Dff)), pinned((1, Dff)),    # w1, b1
                      pinned((Dff, D)), pinned((1, D))],     # w2, b2
            out_specs=row_spec),
        compiler_params=pltpu.CompilerParams(
            dimension_semantics=("parallel",),
            vmem_limit_bytes=vmem_limit),
    )(x2, params["gamma"], params["beta"], w1, params["b1"], w2, params["b2"])
    out = out[:rows].reshape(B, S, D)

    if not return_attn:
        return out

    # NOTE: the reference ResidualConnection discards the attention output; it
    # is materialized here only when explicitly requested (debug / parity).
    attn = _attention_debug(x, params, num_heads=num_heads)
    return out, attn


def _reference(x, p, num_heads):
    """Pure-JAX reference mirroring the PyTorch forward (eval mode)."""
    B, S, D = x.shape
    hd = D // num_heads
    Q = x @ p["wq"]; K = x @ p["wk"]; V = x @ p["wv"]
    q = Q @ p["wiq"] + p["biq"]; k = K @ p["wik"] + p["bik"]; v = V @ p["wiv"] + p["biv"]
    q = q.reshape(B, S, num_heads, hd).transpose(0, 2, 1, 3)
    k = k.reshape(B, S, num_heads, hd).transpose(0, 2, 1, 3)
    v = v.reshape(B, S, num_heads, hd).transpose(0, 2, 1, 3)
    s = jnp.einsum("bhqd,bhkd->bhqk", q, k) / math.sqrt(hd)
    pw = jax.nn.softmax(s, axis=-1)
    ctx = jnp.einsum("bhqk,bhkd->bhqd", pw, v).transpose(0, 2, 1, 3).reshape(B, S, D)
    attn = ctx @ p["wo"] + p["bo"]
    mean = x.mean(-1, keepdims=True)
    var = ((x - mean) ** 2).mean(-1, keepdims=True)
    xn = (x - mean) / jnp.sqrt(var + 1e-5)
    y = x + xn * p["gamma"] + p["beta"]
    h1 = jnp.maximum(y @ p["w1"] + p["b1"], 0.0)
    out = h1 @ p["w2"] + p["b2"]
    return out, attn


if __name__ == "__main__":
    # Small shapes consistent with the module: d_model divisible by num_heads.
    B, S, D, H = 2, 8, 128, 4
    Dff = 4 * D

    key = jax.random.PRNGKey(0)
    keys = jax.random.split(key, 20)

    def w(k, shape, scale=0.05):
        return jax.random.normal(k, shape, jnp.float32) * scale

    # Weights stored already transposed to (in_features, out_features).
    params = {
        "wq": w(keys[0], (D, D)),
        "wk": w(keys[1], (D, D)),
        "wv": w(keys[2], (D, D)),
        "wiq": w(keys[3], (D, D)),
        "wik": w(keys[4], (D, D)),
        "wiv": w(keys[5], (D, D)),
        "biq": w(keys[6], (1, D)),
        "bik": w(keys[7], (1, D)),
        "biv": w(keys[8], (1, D)),
        "wo": w(keys[9], (D, D)),
        "bo": w(keys[10], (1, D)),
        "gamma": jnp.ones((1, D), jnp.float32),
        "beta": jnp.zeros((1, D), jnp.float32),
        "w1": w(keys[11], (D, Dff)),
        "b1": w(keys[12], (1, Dff)),
        "w2": w(keys[13], (Dff, D)),
        "b2": w(keys[14], (1, D)),
    }

    x = jax.random.normal(keys[15], (B, S, D), jnp.float32)

    # Production fast path (f32 matmuls): the module's actual forward output.
    out_f32 = jax.block_until_ready(
        multi_head_attention_layer(x, params, num_heads=H))

    # Production fast path with bf16 MXU operands (v5e/v6e/v7x perf setting).
    out_bf16 = jax.block_until_ready(
        multi_head_attention_layer(x, params, num_heads=H,
                                   matmul_dtype=jnp.bfloat16))

    # Debug path: also materialize the (discarded) attention output.
    out_dbg, attn = multi_head_attention_layer(x, params, num_heads=H,
                                               return_attn=True)
    out_dbg = jax.block_until_ready(out_dbg)
    attn = jax.block_until_ready(attn)

    ref_out, ref_attn = _reference(x, params, H)
    assert jnp.allclose(out_f32, ref_out, atol=1e-4, rtol=1e-4), "f32 fast-path mismatch"
    assert jnp.allclose(out_dbg, ref_out, atol=1e-4, rtol=1e-4), "debug-path output mismatch"
    assert jnp.allclose(attn, ref_attn, atol=1e-4, rtol=1e-4), "attention output mismatch"
    # bf16 MXU operands (f32 accumulation): compare at bf16-appropriate tolerance.
    assert jnp.allclose(out_bf16, ref_out, atol=5e-2, rtol=5e-2), "bf16 fast-path mismatch"

    print("KERNEL_OK")
</pallas_src>

<mosaic_0001>
module attributes {stable_mosaic.version = 11 : i64} {
  func.func @_ffn_kernel(%arg0: i32, %arg1: memref<16x128xf32, #tpu.memory_space<vmem>>, %arg2: memref<1x128xf32, #tpu.memory_space<vmem>>, %arg3: memref<1x128xf32, #tpu.memory_space<vmem>>, %arg4: memref<128x512xf32, #tpu.memory_space<vmem>>, %arg5: memref<1x512xf32, #tpu.memory_space<vmem>>, %arg6: memref<512x128xf32, #tpu.memory_space<vmem>>, %arg7: memref<1x128xf32, #tpu.memory_space<vmem>>, %arg8: memref<16x128xf32, #tpu.memory_space<vmem>>) attributes {dimension_semantics = [#tpu.dimension_semantics<parallel>], iteration_bounds = array<i64: 1>, scalar_prefetch = 0 : i64, scratch_operands = 0 : i64, tpu.core_type = #tpu.core_type<tc>, window_params = [{transform_indices = @transform_0, window_bounds = array<i64: 16, 128>}, {pipeline_mode = #tpu.pipeline_mode<synchronous>, transform_indices = @transform_1, window_bounds = array<i64: 1, 128>}, {pipeline_mode = #tpu.pipeline_mode<synchronous>, transform_indices = @transform_2, window_bounds = array<i64: 1, 128>}, {pipeline_mode = #tpu.pipeline_mode<synchronous>, transform_indices = @transform_3, window_bounds = array<i64: 128, 512>}, {pipeline_mode = #tpu.pipeline_mode<synchronous>, transform_indices = @transform_4, window_bounds = array<i64: 1, 512>}, {pipeline_mode = #tpu.pipeline_mode<synchronous>, transform_indices = @transform_5, window_bounds = array<i64: 512, 128>}, {pipeline_mode = #tpu.pipeline_mode<synchronous>, transform_indices = @transform_6, window_bounds = array<i64: 1, 128>}, {transform_indices = @transform_7, window_bounds = array<i64: 16, 128>}]} {
    %c0 = arith.constant 0 : index
    %c0_0 = arith.constant 0 : index
    %0 = vector.load %arg1[%c0, %c0_0] : memref<16x128xf32, #tpu.memory_space<vmem>>, vector<16x128xf32>
    %cst = arith.constant dense<0.000000e+00> : vector<16xf32>
    %1 = vector.multi_reduction <add>, %0, %cst [1] : vector<16x128xf32> to vector<16xf32>
    %2 = vector.shape_cast %1 : vector<16xf32> to vector<16x1xf32>
    %cst_1 = arith.constant 1.280000e+02 : f32
    %3 = vector.broadcast %cst_1 : f32 to vector<16x1xf32>
    %4 = arith.divf %2, %3 : vector<16x1xf32>
    %5 = vector.broadcast %4 : vector<16x1xf32> to vector<16x128xf32>
    %6 = arith.subf %0, %5 : vector<16x128xf32>
    %7 = arith.mulf %6, %6 : vector<16x128xf32>
    %cst_2 = arith.constant dense<0.000000e+00> : vector<16xf32>
    %8 = vector.multi_reduction <add>, %7, %cst_2 [1] : vector<16x128xf32> to vector<16xf32>
    %9 = vector.shape_cast %8 : vector<16xf32> to vector<16x1xf32>
    %cst_3 = arith.constant 1.280000e+02 : f32
    %10 = vector.broadcast %cst_3 : f32 to vector<16x1xf32>
    %11 = arith.divf %9, %10 : vector<16x1xf32>
    %12 = vector.broadcast %4 : vector<16x1xf32> to vector<16x128xf32>
    %13 = arith.subf %0, %12 : vector<16x128xf32>
    %cst_4 = arith.constant 9.99999974E-6 : f32
    %14 = vector.broadcast %cst_4 : f32 to vector<16x1xf32>
    %15 = arith.addf %11, %14 : vector<16x1xf32>
    %16 = math.rsqrt %15 : vector<16x1xf32>
    %17 = vector.broadcast %16 : vector<16x1xf32> to vector<16x128xf32>
    %18 = arith.mulf %13, %17 : vector<16x128xf32>
    %c0_5 = arith.constant 0 : index
    %c0_6 = arith.constant 0 : index
    %19 = vector.load %arg2[%c0_5, %c0_6] : memref<1x128xf32, #tpu.memory_space<vmem>>, vector<1x128xf32>
    %20 = vector.broadcast %19 : vector<1x128xf32> to vector<16x128xf32>
    %21 = arith.mulf %18, %20 : vector<16x128xf32>
    %22 = arith.addf %0, %21 : vector<16x128xf32>
    %c0_7 = arith.constant 0 : index
    %c0_8 = arith.constant 0 : index
    %23 = vector.load %arg3[%c0_7, %c0_8] : memref<1x128xf32, #tpu.memory_space<vmem>>, vector<1x128xf32>
    %24 = vector.broadcast %23 : vector<1x128xf32> to vector<16x128xf32>
    %25 = arith.addf %22, %24 : vector<16x128xf32>
    %c0_9 = arith.constant 0 : index
    %c0_10 = arith.constant 0 : index
    %26 = vector.load %arg4[%c0_9, %c0_10] : memref<128x512xf32, #tpu.memory_space<vmem>>, vector<128x512xf32>
    %cst_11 = arith.constant dense<0.000000e+00> : vector<16x512xf32>
    %27 = tpu.matmul %25, %26, %cst_11 {dimension_numbers = #tpu.dot_dimension_numbers<[1], [0], [0], [1], [0, 0, 1, 1], [], []>} : vector<16x128xf32>, vector<128x512xf32>, vector<16x512xf32> -> vector<16x512xf32>
    %c0_12 = arith.constant 0 : index
    %c0_13 = arith.constant 0 : index
    %28 = vector.load %arg5[%c0_12, %c0_13] : memref<1x512xf32, #tpu.memory_space<vmem>>, vector<1x512xf32>
    %29 = vector.broadcast %28 : vector<1x512xf32> to vector<16x512xf32>
    %30 = arith.addf %27, %29 : vector<16x512xf32>
    %cst_14 = arith.constant 0.000000e+00 : f32
    %31 = vector.broadcast %cst_14 : f32 to vector<16x512xf32>
    %32 = arith.maximumf %30, %31 : vector<16x512xf32>
    %c0_15 = arith.constant 0 : index
    %c0_16 = arith.constant 0 : index
    %33 = vector.load %arg6[%c0_15, %c0_16] : memref<512x128xf32, #tpu.memory_space<vmem>>, vector<512x128xf32>
    %cst_17 = arith.constant dense<0.000000e+00> : vector<16x128xf32>
    %34 = tpu.matmul %32, %33, %cst_17 {dimension_numbers = #tpu.dot_dimension_numbers<[1], [0], [0], [1], [0, 0, 1, 1], [], []>} : vector<16x512xf32>, vector<512x128xf32>, vector<16x128xf32> -> vector<16x128xf32>
    %c0_18 = arith.constant 0 : index
    %c0_19 = arith.constant 0 : index
    %35 = vector.load %arg7[%c0_18, %c0_19] : memref<1x128xf32, #tpu.memory_space<vmem>>, vector<1x128xf32>
    %36 = vector.broadcast %35 : vector<1x128xf32> to vector<16x128xf32>
    %37 = arith.addf %34, %36 : vector<16x128xf32>
    %c0_20 = arith.constant 0 : index
    %c0_21 = arith.constant 0 : index
    %38 = vector.load %arg8[%c0_20, %c0_21] : memref<16x128xf32, #tpu.memory_space<vmem>>, vector<16x128xf32>
    tpu.vector_store %arg8[%c0_20, %c0_21], %37 {strides = array<i32>} : memref<16x128xf32, #tpu.memory_space<vmem>>, vector<16x128xf32>,
    return
  }
  func.func @transform_0(%arg0: i32) -> (i32, i32) {
    %c0_i32 = arith.constant 0 : i32
    %c0_i32_0 = arith.constant 0 : i32
    return %arg0, %c0_i32 : i32, i32
  }
  func.func @transform_1(%arg0: i32) -> (i32, i32) {
    %c0_i32 = arith.constant 0 : i32
    %c0_i32_0 = arith.constant 0 : i32
    %c0_i32_1 = arith.constant 0 : i32
    return %c0_i32, %c0_i32_0 : i32, i32
  }
  func.func @transform_2(%arg0: i32) -> (i32, i32) {
    %c0_i32 = arith.constant 0 : i32
    %c0_i32_0 = arith.constant 0 : i32
    %c0_i32_1 = arith.constant 0 : i32
    return %c0_i32, %c0_i32_0 : i32, i32
  }
  func.func @transform_3(%arg0: i32) -> (i32, i32) {
    %c0_i32 = arith.constant 0 : i32
    %c0_i32_0 = arith.constant 0 : i32
    %c0_i32_1 = arith.constant 0 : i32
    return %c0_i32, %c0_i32_0 : i32, i32
  }
  func.func @transform_4(%arg0: i32) -> (i32, i32) {
    %c0_i32 = arith.constant 0 : i32
    %c0_i32_0 = arith.constant 0 : i32
    %c0_i32_1 = arith.constant 0 : i32
    return %c0_i32, %c0_i32_0 : i32, i32
  }
  func.func @transform_5(%arg0: i32) -> (i32, i32) {
    %c0_i32 = arith.constant 0 : i32
    %c0_i32_0 = arith.constant 0 : i32
    %c0_i32_1 = arith.constant 0 : i32
    return %c0_i32, %c0_i32_0 : i32, i32
  }
  func.func @transform_6(%arg0: i32) -> (i32, i32) {
    %c0_i32 = arith.constant 0 : i32
    %c0_i32_0 = arith.constant 0 : i32
    %c0_i32_1 = arith.constant 0 : i32
    return %c0_i32, %c0_i32_0 : i32, i32
  }
  func.func @transform_7(%arg0: i32) -> (i32, i32) {
    %c0_i32 = arith.constant 0 : i32
    %c0_i32_0 = arith.constant 0 : i32
    return %arg0, %c0_i32 : i32, i32
  }
}

</mosaic_0001>

<bundles_post_ra>
// kernel: tpu_custom_call.1
= control target key start
LH: loop header
LB: loop body
LE: loop exit
PB: predicated region body
PF: predicated region fallthrough
CT: control target
= control target key end

     0   :  { %12 = vsyncpa [#allocation3], 0  ;;  %s882_s0 = inlined_call_operand.hbm [shape: f32[16,128], index: 0, kind: input, shape index: {}]   ;;  %s883_s1 = inlined_call_operand.vmem [shape: f32[1,128], index: 1, kind: input, shape index: {}]   ;;  %s884_s2 = inlined_call_operand.vmem [shape: f32[1,128], index: 2, kind: input, shape index: {}]   ;;  %s885_s3 = inlined_call_operand.hbm [shape: f32[128,512], index: 3, kind: input, shape index: {}]   ;;  %s886_s4 = inlined_call_operand.vmem [shape: f32[1,512], index: 4, kind: input, shape index: {}]   ;;  %s887_s5 = inlined_call_operand.hbm [shape: f32[512,128], index: 5, kind: input, shape index: {}]   ;;  %s888_s6 = inlined_call_operand.vmem [shape: f32[1,128], index: 6, kind: input, shape index: {}]   ;;  %s889_s7 = inlined_call_operand.hbm [shape: f32[16,128], index: 7, kind: output, shape index: {}]  }
   0x1   :  { %13 = vsyncpa [#allocation6], 0 }
   0x2   :  { %14 = vsyncpa [#allocation4], 0  ;;  %s780_s24 = smov [#allocation5]  }
   0x3   :  { %s36_s25 = sshll.u32 %s780_s24, 4  ;;  %s37_s25 = int_to_ptr.vmem [resolvable:$true] %s36_s25 }
   0x4   :  { %s702_s26 = scalar_lea.vmem %s37_s25, 8192  ;;  %p707_p1 = scmp.lt.s32.totalorder %s37_s25, %s37_s25 }
   0x5   :  { %p703_p0 = scmp.ne.s32.totalorder %s37_s25, %s702_s26  ;;  %p708_p2 = scmp.lt.s32.totalorder %s702_s26, %s702_s26 }
   0x7   :  { %p709_p3 = por %p708_p2, %p707_p1 }
   0x9   :  { %p710_p4 = pnand %p709_p3, %p703_p0 }
   0xb   :  { %713 = shalt.err (!%p710_p4)
}
   0xc   :  { %s781_s27 = smov 512   ;;  %s782_s28 = smov 32  }
   0xd   :  { %42 = dma.hbm_to_vmem [thread:$0]  %s885_s3, 8192, %s37_s25, [#allocation6], %s781_s27, %s781_s27, %s782_s28  }
   0xe   :  { %s783_s8 = smov [#allocation2]  }
   0xf   :  { %s20_s9 = sshll.u32 %s783_s8, 4  ;;  %s21_s9 = int_to_ptr.vmem [resolvable:$true] %s20_s9 }
  0x10   :  { %s722_s10 = scalar_lea.vmem %s21_s9, 256  ;;  %p727_p6 = scmp.lt.s32.totalorder %s21_s9, %s21_s9 }
  0x11   :  { %p723_p5 = scmp.ne.s32.totalorder %s21_s9, %s722_s10  ;;  %p728_p7 = scmp.lt.s32.totalorder %s722_s10, %s722_s10 }
  0x13   :  { %p729_p8 = por %p728_p7, %p727_p6 }
  0x15   :  { %p730_p9 = pnand %p729_p8, %p723_p5 }
  0x17   :  { %733 = shalt.err (!%p730_p9)
}
  0x18   :  { %s784_s11 = smov 128   ;;  %s785_s12 = smov 8  }
  0x19   :  { %26 = dma.hbm_to_vmem [thread:$0]  %s882_s0, 256, %s21_s9, [#allocation3], %s784_s11, %s784_s11, %s785_s12  }
  0x1a   :  { %s786_s3 = smov [#allocation7]  }
  0x1b   :  { %s50_s15 = sshll.u32 %s786_s3, 4  ;;  %s51_s15 = int_to_ptr.vmem [resolvable:$true] %s50_s15 }
  0x1c   :  { %s742_s16 = scalar_lea.vmem %s51_s15, 8192  ;;  %p747_p11 = scmp.lt.s32.totalorder %s51_s15, %s51_s15 }
  0x1d   :  { %p743_p10 = scmp.ne.s32.totalorder %s51_s15, %s742_s16  ;;  %p748_p12 = scmp.lt.s32.totalorder %s742_s16, %s742_s16 }
  0x1f   :  { %p749_p13 = por %p748_p12, %p747_p11 }
  0x21   :  { %p750_p0 = pnand %p749_p13, %p743_p10 }
  0x23   :  { %753 = shalt.err (!%p750_p0)
}
  0x24   :  { %56 = dma.hbm_to_vmem [thread:$0]  %s887_s5, 8192, %s51_s15, [#allocation6], %s784_s11, %s784_s11, %s785_s12  }
  0x25   :  { %774 = dma.done.wait [#allocation3], 256  }
  0x26   :  { %775 = vsyncadd [#allocation3], 4294967040 }
  0x27   :  { %776 = dma.done.wait [#allocation6], 16384  }
  0x28   :  { %777 = vsyncadd [#allocation6], 4294950912  ;;  %v844_v0 = vld [vmem:[#allocation2] sm:$0xff]  ;;  %v847_v1 = vld [vmem:[#allocation2 + $0x8] sm:$0xff]  ;;  %s788_s22 = smov [#allocation8]  }
  0x29   :  { %70 = vadd.xlane.f32.xlu0 %v844_v0  ;;  %v174_v2 = vld [vmem:[#allocation5 + $0x1e8] sm:$0xff]  ;;  %v176_v3 = vld [vmem:[#allocation5 + $0x1f8] sm:$0xff]  ;;  %v173_v4 = vld [vmem:[#allocation5 + $0x1e0] sm:$0xff]  ;;  %s589_s23 = sshll.u32 %s788_s22, 4  ;;  %s590_s23 = int_to_ptr.vmem [resolvable:$true] %s589_s23 }
  0x2a   :  { %199 = vmatprep.subr.mxu0 %v174_v2  ;;  %276 = vmatprep.subr.mxu1 %v176_v3  ;;  %v175_v5 = vld [vmem:[#allocation5 + $0x1f0] sm:$0xff]  ;;  %v170_v6 = vld [vmem:[#allocation5 + $0x1c8] sm:$0xff]  ;;  %v172_v7 = vld [vmem:[#allocation5 + $0x1d8] sm:$0xff]  ;;  %p759_p2 = scmp.lt.s32.totalorder %s590_s23, %s590_s23 }
  0x2b   :  { %200 = vmatpush1.msra.mxu0 %v173_v4  ;;  %277 = vmatpush1.msra.mxu1 %v175_v5  ;;  %v169_v8 = vld [vmem:[#allocation5 + $0x1c0] sm:$0xff]  ;;  %v171_v9 = vld [vmem:[#allocation5 + $0x1d0] sm:$0xff]  ;;  %v166_v10 = vld [vmem:[#allocation5 + $0x1a8] sm:$0xff] }
  0x2c   :  { %201 = vmatprep.subr.mxu0 %v170_v6  ;;  %278 = vmatprep.subr.mxu1 %v172_v7  ;;  %v168_v11 = vld [vmem:[#allocation5 + $0x1b8] sm:$0xff]  ;;  %v165_v12 = vld [vmem:[#allocation5 + $0x1a0] sm:$0xff]  ;;  %v167_v13 = vld [vmem:[#allocation5 + $0x1b0] sm:$0xff] }
  0x2d   :  { %72 = vadd.xlane.f32.xlu0 %v847_v1  ;;  %202 = vmatpush1.msra.mxu0 %v169_v8  ;;  %v162_v22 = vld [vmem:[#allocation5 + $0x188] sm:$0xff]  ;;  %v164_v23 = vld [vmem:[#allocation5 + $0x198] sm:$0xff]  ;;  %v161_v24 = vld [vmem:[#allocation5 + $0x180] sm:$0xff] }
  0x2e   :  { %279 = vmatpush1.msra.mxu1 %v171_v9  ;;  %203 = vmatprep.subr.mxu0 %v166_v10  ;;  %v163_v25 = vld [vmem:[#allocation5 + $0x190] sm:$0xff]  ;;  %v158_v26 = vld [vmem:[#allocation5 + $0x168] sm:$0xff]  ;;  %v160_v27 = vld [vmem:[#allocation5 + $0x178] sm:$0xff] }
  0x2f   :  { %280 = vmatprep.subr.mxu1 %v168_v11  ;;  %204 = vmatpush1.msra.mxu0 %v165_v12  ;;  %v157_v28 = vld [vmem:[#allocation5 + $0x160] sm:$0xff]  ;;  %v159_v29 = vld [vmem:[#allocation5 + $0x170] sm:$0xff]  ;;  %v154_v30 = vld [vmem:[#allocation5 + $0x148] sm:$0xff]  ;;  %v787_v12 = vmov 0.0  }
  0x30   :  { %281 = vmatpush1.msra.mxu1 %v167_v13  ;;  %205 = vmatprep.subr.mxu0 %v162_v22  ;;  %v156_v31 = vld [vmem:[#allocation5 + $0x158] sm:$0xff]  ;;  %v153_v32 = vld [vmem:[#allocation5 + $0x140] sm:$0xff]  ;;  %v155_v33 = vld [vmem:[#allocation5 + $0x150] sm:$0xff] }
  0x31   :  { %282 = vmatprep.subr.mxu1 %v164_v23  ;;  %206 = vmatpush1.msra.mxu0 %v161_v24  ;;  %v150_v34 = vld [vmem:[#allocation5 + $0x128] sm:$0xff]  ;;  %v152_v35 = vld [vmem:[#allocation5 + $0x138] sm:$0xff]  ;;  %v149_v36 = vld [vmem:[#allocation5 + $0x120] sm:$0xff] }
  0x32   :  { %283 = vmatpush1.msra.mxu1 %v163_v25  ;;  %207 = vmatprep.subr.mxu0 %v158_v26  ;;  %v151_v37 = vld [vmem:[#allocation5 + $0x130] sm:$0xff]  ;;  %v146_v38 = vld [vmem:[#allocation5 + $0x108] sm:$0xff]  ;;  %v148_v39 = vld [vmem:[#allocation5 + $0x118] sm:$0xff] }
  0x33   :  { %284 = vmatprep.subr.mxu1 %v160_v27  ;;  %208 = vmatpush1.msra.mxu0 %v157_v28  ;;  %v145_v40 = vld [vmem:[#allocation5 + $0x100] sm:$0xff]  ;;  %v147_v41 = vld [vmem:[#allocation5 + $0x110] sm:$0xff]  ;;  %v142_v42 = vld [vmem:[#allocation5 + $0xe8] sm:$0xff] }
  0x34   :  { %285 = vmatpush1.msra.mxu1 %v159_v29  ;;  %209 = vmatprep.subr.mxu0 %v154_v30  ;;  %v144_v43 = vld [vmem:[#allocation5 + $0xf8] sm:$0xff]  ;;  %v141_v44 = vld [vmem:[#allocation5 + $0xe0] sm:$0xff]  ;;  %v143_v45 = vld [vmem:[#allocation5 + $0xf0] sm:$0xff] }
  0x35   :  { %286 = vmatprep.subr.mxu1 %v156_v31  ;;  %210 = vmatpush1.msra.mxu0 %v153_v32  ;;  %v138_v46 = vld [vmem:[#allocation5 + $0xc8] sm:$0xff]  ;;  %v140_v47 = vld [vmem:[#allocation5 + $0xd8] sm:$0xff]  ;;  %v137_v48 = vld [vmem:[#allocation5 + $0xc0] sm:$0xff] }
  0x36   :  { %287 = vmatpush1.msra.mxu1 %v155_v33  ;;  %211 = vmatprep.subr.mxu0 %v150_v34  ;;  %v139_v49 = vld [vmem:[#allocation5 + $0xd0] sm:$0xff]  ;;  %v134_v50 = vld [vmem:[#allocation5 + $0xa8] sm:$0xff]  ;;  %v136_v51 = vld [vmem:[#allocation5 + $0xb8] sm:$0xff] }
  0x37   :  { %288 = vmatprep.subr.mxu1 %v152_v35  ;;  %212 = vmatpush1.msra.mxu0 %v149_v36  ;;  %v133_v52 = vld [vmem:[#allocation5 + $0xa0] sm:$0xff]  ;;  %v135_v53 = vld [vmem:[#allocation5 + $0xb0] sm:$0xff]  ;;  %v130_v54 = vld [vmem:[#allocation5 + $0x88] sm:$0xff] }
  0x38   :  { %289 = vmatpush1.msra.mxu1 %v151_v37  ;;  %213 = vmatprep.subr.mxu0 %v146_v38  ;;  %v132_v55 = vld [vmem:[#allocation5 + $0x98] sm:$0xff]  ;;  %v129_v56 = vld [vmem:[#allocation5 + $0x80] sm:$0xff]  ;;  %v131_v57 = vld [vmem:[#allocation5 + $0x90] sm:$0xff] }
  0x39   :  { %290 = vmatprep.subr.mxu1 %v148_v39  ;;  %214 = vmatpush1.msra.mxu0 %v145_v40  ;;  %v126_v58 = vld [vmem:[#allocation5 + $0x68] sm:$0xff]  ;;  %v128_v59 = vld [vmem:[#allocation5 + $0x78] sm:$0xff]  ;;  %v125_v60 = vld [vmem:[#allocation5 + $0x60] sm:$0xff] }
  0x3a   :  { %291 = vmatpush1.msra.mxu1 %v147_v41  ;;  %215 = vmatprep.subr.mxu0 %v142_v42  ;;  %v127_v61 = vld [vmem:[#allocation5 + $0x70] sm:$0xff]  ;;  %v122_v62 = vld [vmem:[#allocation5 + $0x48] sm:$0xff]  ;;  %v124_v63 = vld [vmem:[#allocation5 + $0x58] sm:$0xff] }
  0x3b   :  { %292 = vmatprep.subr.mxu1 %v144_v43  ;;  %216 = vmatpush1.msra.mxu0 %v141_v44  ;;  %v121_v2 = vld [vmem:[#allocation5 + $0x40] sm:$0xff]  ;;  %v123_v3 = vld [vmem:[#allocation5 + $0x50] sm:$0xff]  ;;  %v118_v4 = vld [vmem:[#allocation5 + $0x28] sm:$0xff] }
  0x3c   :  { %293 = vmatpush1.msra.mxu1 %v143_v45  ;;  %217 = vmatprep.subr.mxu0 %v138_v46  ;;  %v120_v5 = vld [vmem:[#allocation5 + $0x38] sm:$0xff]  ;;  %v117_v6 = vld [vmem:[#allocation5 + $0x20] sm:$0xff]  ;;  %v119_v7 = vld [vmem:[#allocation5 + $0x30] sm:$0xff] }
  0x3d   :  { %294 = vmatprep.subr.mxu1 %v140_v47  ;;  %218 = vmatpush1.msra.mxu0 %v137_v48  ;;  %v114_v8 = vld [vmem:[#allocation5 + $0x8] sm:$0xff]  ;;  %v116_v9 = vld [vmem:[#allocation5 + $0x18] sm:$0xff]  ;;  %v113_v10 = vld [vmem:[#allocation5] sm:$0xff] }
  0x3e   :  { %295 = vmatpush1.msra.mxu1 %v139_v49  ;;  %219 = vmatprep.subr.mxu0 %v134_v50  ;;  %v115_v11 = vld [vmem:[#allocation5 + $0x10] sm:$0xff]  ;;  %v392_v13 = vld [vmem:[#allocation7 + $0xf8] sm:$0xff]  ;;  %v374_v40 = vld [vmem:[#allocation7 + $0x68] sm:$0xff] }
  0x3f   :  { %296 = vmatprep.subr.mxu1 %v136_v51  ;;  %220 = vmatpush1.msra.mxu0 %v133_v52  ;;  %v602_v24 = vld [vmem:[%s883_s1] ss:$0 sm:$0xff]  ;;  %v376_v33 = vld [vmem:[#allocation7 + $0x78] sm:$0xff]  ;;  %v406_v41 = vld [vmem:[#allocation7 + $0x168] sm:$0xff] }
  0x40   :  { %297 = vmatpush1.msra.mxu1 %v135_v53  ;;  %221 = vmatprep.subr.mxu0 %v130_v54  ;;  %v603_v28 = vld [vmem:[%s884_s2] ss:$0 sm:$0xff]  ;;  %v408_v34 = vld [vmem:[#allocation7 + $0x178] sm:$0xff]  ;;  %v421_v42 = vld [vmem:[#allocation7 + $0x1e0] sm:$0xff] }
  0x41   :  { %298 = vmatprep.subr.mxu1 %v132_v55  ;;  %222 = vmatpush1.msra.mxu0 %v129_v56  ;;  %v391_v36 = vld [vmem:[#allocation7 + $0xf0] sm:$0xff]  ;;  %v373_v43 = vld [vmem:[#allocation7 + $0x60] sm:$0xff]  ;;  %v388_v45 = vld [vmem:[#allocation7 + $0xd8] sm:$0xff] }
  0x42   :  { %299 = vmatpush1.msra.mxu1 %v131_v57  ;;  %223 = vmatprep.subr.mxu0 %v126_v58  ;;  %v375_v38 = vld [vmem:[#allocation7 + $0x70] sm:$0xff]  ;;  %v405_v44 = vld [vmem:[#allocation7 + $0x160] sm:$0xff]  ;;  %v420_v46 = vld [vmem:[#allocation7 + $0x1d8] sm:$0xff] }
  0x43   :  { %300 = vmatprep.subr.mxu1 %v128_v59  ;;  %224 = vmatpush1.msra.mxu0 %v125_v60  ;;  %v407_v39 = vld [vmem:[#allocation7 + $0x170] sm:$0xff]  ;;  %v372_v47 = vld [vmem:[#allocation7 + $0x58] sm:$0xff]  ;;  %v386_v53 = vld [vmem:[#allocation7 + $0xc8] sm:$0xff] }
  0x44   :  { %301 = vmatpush1.msra.mxu1 %v127_v61  ;;  %225 = vmatprep.subr.mxu0 %v122_v62  ;;  %v404_v48 = vld [vmem:[#allocation7 + $0x158] sm:$0xff]  ;;  %v387_v49 = vld [vmem:[#allocation7 + $0xd0] sm:$0xff]  ;;  %v418_v54 = vld [vmem:[#allocation7 + $0x1c8] sm:$0xff] }
  0x45   :  { %302 = vmatprep.subr.mxu1 %v124_v63  ;;  %226 = vmatpush1.msra.mxu0 %v121_v2  ;;  %v419_v50 = vld [vmem:[#allocation7 + $0x1d0] sm:$0xff]  ;;  %v370_v55 = vld [vmem:[#allocation7 + $0x48] sm:$0xff]  ;;  %v385_v57 = vld [vmem:[#allocation7 + $0xc0] sm:$0xff] }
  0x46   :  { %303 = vmatpush1.msra.mxu1 %v123_v3  ;;  %227 = vmatprep.subr.mxu0 %v118_v4  ;;  %v371_v51 = vld [vmem:[#allocation7 + $0x50] sm:$0xff]  ;;  %v402_v56 = vld [vmem:[#allocation7 + $0x148] sm:$0xff]  ;;  %v417_v58 = vld [vmem:[#allocation7 + $0x1c0] sm:$0xff] }
  0x47   :  { %304 = vmatprep.subr.mxu1 %v120_v5  ;;  %228 = vmatpush1.msra.mxu0 %v117_v6  ;;  %v403_v52 = vld [vmem:[#allocation7 + $0x150] sm:$0xff]  ;;  %v369_v59 = vld [vmem:[#allocation7 + $0x40] sm:$0xff]  ;;  %v384_v61 = vld [vmem:[#allocation7 + $0xb8] sm:$0xff] }
  0x48   :  { %305 = vmatpush1.msra.mxu1 %v119_v7  ;;  %229 = vmatprep.subr.mxu0 %v114_v8  ;;  %v401_v60 = vld [vmem:[#allocation7 + $0x140] sm:$0xff]  ;;  %v416_v62 = vld [vmem:[#allocation7 + $0x1b8] sm:$0xff]  ;;  %v383_v3 = vld [vmem:[#allocation7 + $0xb0] sm:$0xff] }
  0x49   :  { %306 = vmatprep.subr.mxu1 %v116_v9  ;;  %230 = vmatpush1.msra.mxu0 %v113_v10  ;;  %v368_v63 = vld [vmem:[#allocation7 + $0x38] sm:$0xff]  ;;  %v415_v4 = vld [vmem:[#allocation7 + $0x1b0] sm:$0xff]  ;;  %v382_v7 = vld [vmem:[#allocation7 + $0xa8] sm:$0xff] }
  0x4a   :  { %263 = vmatprep.mubr.f32.mxu0 %v787_v12  ;;  %307 = vmatpush1.msra.mxu1 %v115_v11  ;;  %v400_v2 = vld [vmem:[#allocation7 + $0x138] sm:$0xff]  ;;  %v367_v5 = vld [vmem:[#allocation7 + $0x30] sm:$0xff]  ;;  %v414_v8 = vld [vmem:[#allocation7 + $0x1a8] sm:$0xff] }
  0x4b   :  { %340 = vmatprep.mubr.f32.mxu1 %v787_v12  ;;  %605 = vmatprep.subr.mxu0 %v392_v13  ;;  %v399_v6 = vld [vmem:[#allocation7 + $0x130] sm:$0xff]  ;;  %v366_v9 = vld [vmem:[#allocation7 + $0x28] sm:$0xff]  ;;  %v381_v11 = vld [vmem:[#allocation7 + $0xa0] sm:$0xff] }
  0x4c   :  { %v398_v10 = vld [vmem:[#allocation7 + $0x128] sm:$0xff]  ;;  %v365_v13 = vld [vmem:[#allocation7 + $0x20] sm:$0xff] }
  0xb2   :  { %v71_v14 = vpop.xlane.xlu0 %70 }
  0xb3   :  { %v75_v15 = vmul.f32 0.0078125, %v71_v14  ;;  %v424_v14 = vld [vmem:[#allocation7 + $0x1f8] sm:$0xff] }
  0xb4   :  { %643 = vmatprep.subr.mxu1 %v424_v14  ;;  %v397_v14 = vld [vmem:[#allocation7 + $0x120] sm:$0xff] }
  0xb5   :  { %v851_v16 = vsub.f32 %v844_v0, %v75_v15 }
  0xb6   :  { %v73_v17 = vpop.xlane.xlu0 %72 }
  0xb7   :  { %v76_v18 = vmul.f32 0.0078125, %v73_v17  ;;  %v79_v19 = vmul.f32 %v851_v16, %v851_v16 }
  0xb9   :  { %v856_v20 = vsub.f32 %v847_v1, %v76_v18  ;;  %81 = vadd.xlane.f32.xlu1 %v79_v19 }
  0xbb   :  { %v80_v21 = vmul.f32 %v856_v20, %v856_v20 }
  0xbd   :  { %83 = vadd.xlane.f32.xlu1 %v80_v21 }
 0x142   :  { %v82_v15 = vpop.xlane.xlu1 %81 }
 0x143   :  { %v85_v17 = vmul.f32 0.0078125, %v82_v15  ;;  %v380_v15 = vld [vmem:[#allocation7 + $0x98] sm:$0xff] }
 0x145   :  { %v87_v18 = vadd.f32 1e-05, %v85_v17  ;;  %v412_v17 = vld [vmem:[#allocation7 + $0x198] sm:$0xff] }
 0x146   :  { %v84_v19 = vpop.xlane.xlu1 %83 }
 0x147   :  { %690 = vrsqrt.f32 %v87_v18  ;;  %v86_v21 = vmul.f32 0.0078125, %v84_v19  ;;  %v364_v18 = vld [vmem:[#allocation7 + $0x18] sm:$0xff] }
 0x148   :  { %v396_v19 = vld [vmem:[#allocation7 + $0x118] sm:$0xff] }
 0x149   :  { %v88_v22 = vadd.f32 1e-05, %v86_v21  ;;  %v379_v21 = vld [vmem:[#allocation7 + $0x90] sm:$0xff] }
 0x14b   :  { %692 = vrsqrt.f32 %v88_v22  ;;  %v411_v22 = vld [vmem:[#allocation7 + $0x190] sm:$0xff] }
 0x154   :  { %v691_v23 = vpop.eup %690 }
 0x155   :  { %v91_v25 = vmul.f32 %v691_v23, %v851_v16  ;;  %v423_v16 = vld [vmem:[#allocation7 + $0x1f0] sm:$0xff] }
 0x156   :  { %v363_v23 = vld [vmem:[#allocation7 + $0x10] sm:$0xff] }
 0x157   :  { %v100_v26 = vmul.f32 %v602_v24, %v91_v25  ;;  %v378_v25 = vld [vmem:[#allocation7 + $0x88] sm:$0xff] }
 0x158   :  { %v693_v27 = vpop.eup %692 }
 0x159   :  { %v102_v29 = vadd.f32 %v100_v26, %v844_v0  ;;  %v92_v30 = vmul.f32 %v693_v27, %v856_v20  ;;  %v390_v0 = vld [vmem:[#allocation7 + $0xe8] sm:$0xff] }
 0x15a   :  { %v422_v20 = vld [vmem:[#allocation7 + $0x1e8] sm:$0xff] }
 0x15b   :  { %v111_v31 = vadd.f32 %v603_v28, %v102_v29  ;;  %v101_v32 = vmul.f32 %v602_v24, %v92_v30  ;;  %v395_v24 = vld [vmem:[#allocation7 + $0x110] sm:$0xff]  ;;  %v410_v26 = vld [vmem:[#allocation7 + $0x188] sm:$0xff]  ;;  %v377_v29 = vld [vmem:[#allocation7 + $0x80] sm:$0xff] }
 0x15c   :  { %v362_v27 = vld [vmem:[#allocation7 + $0x8] sm:$0xff]  ;;  %v409_v30 = vld [vmem:[#allocation7 + $0x180] sm:$0xff] }
 0x15d   :  { %264 = vmatmul.mubr.f32.vlgmr.msra.gmra.mxu0 %v111_v31  ;;  %341 = vmatmul.mubr.f32.vlgmr.msra.gmra.mxu1 %v111_v31  ;;  %v103_v35 = vadd.f32 %v101_v32, %v847_v1  ;;  %v389_v1 = vld [vmem:[#allocation7 + $0xe0] sm:$0xff] }
 0x15e   :  { %269 = vmatprep.mubr.f32.mxu0 %v787_v12  ;;  %346 = vmatprep.mubr.f32.mxu1 %v787_v12  ;;  %v413_v12 = vld [vmem:[#allocation7 + $0x1a0] sm:$0xff] }
 0x15f   :  { %v112_v37 = vadd.f32 %v603_v28, %v103_v35  ;;  %606 = vmatpush3.msra.mxu0 %v376_v33  ;;  %644 = vmatpush3.msra.mxu1 %v408_v34  ;;  %v394_v28 = vld [vmem:[#allocation7 + $0x108] sm:$0xff]  ;;  %v361_v31 = vld [vmem:[#allocation7] sm:$0xff]  ;;  %v179_v33 = vlaneseq }
 0x160   :  { %607 = vmatprep.subr.mxu0 %v391_v36  ;;  %645 = vmatprep.subr.mxu1 %v423_v16  ;;  %v393_v32 = vld [vmem:[#allocation7 + $0x100] sm:$0xff]  ;;  %v177_v16 = vld [vmem:[%s886_s4] sm:$0xf] }
 0x161   :  { %270 = vmatmul.mubr.f32.gmra.mxu0 %v112_v37  ;;  %347 = vmatmul.mubr.f32.gmra.mxu1 %v112_v37  ;;  %v180_v34 = vshrl.u32 %v179_v33, 7 }
 0x162   :  { %608 = vmatpush3.msra.mxu0 %v375_v38  ;;  %646 = vmatpush3.msra.mxu1 %v407_v39 }
 0x163   :  { %609 = vmatprep.subr.mxu0 %v390_v0  ;;  %647 = vmatprep.subr.mxu1 %v422_v20  ;;  %v181_v35 = vsub.s32 0, %v180_v34  ;;  %v189_v36 = vsub.s32 2, %v180_v34  ;;  %v185_v37 = vsub.s32 1, %v180_v34  ;;  %v193_v38 = vsub.s32 3, %v180_v34 }
 0x164   :  { %610 = vmatpush3.msra.mxu0 %v374_v40  ;;  %648 = vmatpush3.msra.mxu1 %v406_v41 }
 0x165   :  { %611 = vmatprep.subr.mxu0 %v389_v1  ;;  %649 = vmatprep.subr.mxu1 %v421_v42  ;;  %v182_v39 = vrot.slane %v177_v16, %v181_v35  ;;  %v190_v0 = vrot.slane %v177_v16, %v189_v36  ;;  %v186_v20 = vrot.slane %v177_v16, %v185_v37 }
 0x166   :  { %612 = vmatpush3.msra.mxu0 %v373_v43  ;;  %650 = vmatpush3.msra.mxu1 %v405_v44  ;;  %v194_v40 = vrot.slane %v177_v16, %v193_v38 }
 0x167   :  { %613 = vmatprep.subr.mxu0 %v388_v45  ;;  %651 = vmatprep.subr.mxu1 %v420_v46 }
 0x168   :  { %614 = vmatpush3.msra.mxu0 %v372_v47  ;;  %652 = vmatpush3.msra.mxu1 %v404_v48 }
 0x169   :  { %615 = vmatprep.subr.mxu0 %v387_v49  ;;  %653 = vmatprep.subr.mxu1 %v419_v50 }
 0x16a   :  { %616 = vmatpush3.msra.mxu0 %v371_v51  ;;  %654 = vmatpush3.msra.mxu1 %v403_v52 }
 0x16b   :  { %617 = vmatprep.subr.mxu0 %v386_v53  ;;  %655 = vmatprep.subr.mxu1 %v418_v54 }
 0x16c   :  { %618 = vmatpush3.msra.mxu0 %v370_v55  ;;  %656 = vmatpush3.msra.mxu1 %v402_v56 }
 0x16d   :  { %619 = vmatprep.subr.mxu0 %v385_v57  ;;  %657 = vmatprep.subr.mxu1 %v417_v58 }
 0x16e   :  { %620 = vmatpush3.msra.mxu0 %v369_v59  ;;  %658 = vmatpush3.msra.mxu1 %v401_v60 }
 0x16f   :  { %621 = vmatprep.subr.mxu0 %v384_v61  ;;  %659 = vmatprep.subr.mxu1 %v416_v62 }
 0x170   :  { %622 = vmatpush3.msra.mxu0 %v368_v63  ;;  %660 = vmatpush3.msra.mxu1 %v400_v2 }
 0x171   :  { %623 = vmatprep.subr.mxu0 %v383_v3  ;;  %661 = vmatprep.subr.mxu1 %v415_v4  ;;  %v604_v4 = vld [vmem:[%s888_s6] ss:$0 sm:$0xff]  ;;  %s754_s6 = scalar_lea.vmem %s590_s23, 256 }
 0x172   :  { %624 = vmatpush3.msra.mxu0 %v367_v5  ;;  %662 = vmatpush3.msra.mxu1 %v399_v6  ;;  %p755_p1 = scmp.ne.s32.totalorder %s590_s23, %s754_s6  ;;  %p760_p3 = scmp.lt.s32.totalorder %s754_s6, %s754_s6 }
 0x173   :  { %625 = vmatprep.subr.mxu0 %v382_v7  ;;  %663 = vmatprep.subr.mxu1 %v414_v8 }
 0x174   :  { %626 = vmatpush3.msra.mxu0 %v366_v9  ;;  %664 = vmatpush3.msra.mxu1 %v398_v10  ;;  %p761_p4 = por %p760_p3, %p759_p2 }
 0x175   :  { %627 = vmatprep.subr.mxu0 %v381_v11  ;;  %665 = vmatprep.subr.mxu1 %v413_v12 }
 0x176   :  { %628 = vmatpush3.msra.mxu0 %v365_v13  ;;  %666 = vmatpush3.msra.mxu1 %v397_v14  ;;  %p762_p5 = pnand %p761_p4, %p755_p1 }
 0x177   :  { %629 = vmatprep.subr.mxu0 %v380_v15  ;;  %667 = vmatprep.subr.mxu1 %v412_v17 }
 0x178   :  { %630 = vmatpush3.msra.mxu0 %v364_v18  ;;  %668 = vmatpush3.msra.mxu1 %v396_v19 }
 0x179   :  { %631 = vmatprep.subr.mxu0 %v379_v21  ;;  %669 = vmatprep.subr.mxu1 %v411_v22 }
 0x17a   :  { %632 = vmatpush3.msra.mxu0 %v363_v23  ;;  %670 = vmatpush3.msra.mxu1 %v395_v24 }
 0x17b   :  { %633 = vmatprep.subr.mxu0 %v378_v25  ;;  %671 = vmatprep.subr.mxu1 %v410_v26 }
 0x17c   :  { %634 = vmatpush3.msra.mxu0 %v362_v27  ;;  %672 = vmatpush3.msra.mxu1 %v394_v28 }
 0x17d   :  { %635 = vmatprep.subr.mxu0 %v377_v29  ;;  %673 = vmatprep.subr.mxu1 %v409_v30 }
 0x17e   :  { %636 = vmatpush3.msra.mxu0 %v361_v31  ;;  %674 = vmatpush3.msra.mxu1 %v393_v32 }
 0x21d   :  { %v265_v41 = vpop.f32.mrf.mxu0  ;;  %v342_v1 = vpop.f32.mrf.mxu1 }
 0x21e   :  { %v266_v42 = vadd.f32 %v265_v41, %v182_v39  ;;  %v343_v43 = vadd.f32 %v342_v1, %v190_v0 }
 0x21f   :  { %v267_v44 = vpop.f32.mrf.mxu0  ;;  %v344_v45 = vpop.f32.mrf.mxu1 }
 0x220   :  { %v268_v46 = vadd.f32 %v267_v44, %v186_v20  ;;  %v345_v47 = vadd.f32 %v344_v45, %v194_v40  ;;  %v353_v52 = vmax.f32 %v266_v42, 0.0  ;;  %v355_v53 = vmax.f32 %v343_v43, 0.0 }
 0x221   :  { %v271_v48 = vpop.f32.mrf.mxu0  ;;  %v348_v49 = vpop.f32.mrf.mxu1 }
 0x222   :  { %v354_v50 = vmax.f32 %v268_v46, 0.0  ;;  %v356_v51 = vmax.f32 %v345_v47, 0.0  ;;  %v272_v54 = vadd.f32 %v271_v48, %v182_v39  ;;  %v349_v55 = vadd.f32 %v348_v49, %v190_v0 }
 0x223   :  { %v273_v56 = vpop.f32.mrf.mxu0  ;;  %v350_v57 = vpop.f32.mrf.mxu1 }
 0x224   :  { %v274_v58 = vadd.f32 %v273_v56, %v186_v20  ;;  %v351_v59 = vadd.f32 %v350_v57, %v194_v40  ;;  %496 = vmatprep.mubr.f32.mxu0 %v354_v50  ;;  %571 = vmatprep.mubr.f32.mxu1 %v356_v51  ;;  %v357_v62 = vmax.f32 %v272_v54, 0.0  ;;  %v359_v63 = vmax.f32 %v349_v55, 0.0 }
 0x225   :  { %497 = vmatmul.mubr.f32.vlgmr.msra.gmra.mxu0 %v353_v52  ;;  %572 = vmatmul.mubr.f32.vlgmr.msra.gmra.mxu1 %v355_v53 }
 0x226   :  { %v358_v60 = vmax.f32 %v274_v58, 0.0  ;;  %v360_v61 = vmax.f32 %v351_v59, 0.0 }
 0x228   :  { %501 = vmatprep.mubr.f32.mxu0 %v358_v60  ;;  %576 = vmatprep.mubr.f32.mxu1 %v360_v61 }
 0x229   :  { %502 = vmatmul.mubr.f32.gmra.mxu0 %v357_v62  ;;  %577 = vmatmul.mubr.f32.gmra.mxu1 %v359_v63 }
 0x2e5   :  { %v637_v2 = vpop.f32.mrf.mxu0  ;;  %v675_v3 = vpop.f32.mrf.mxu1 }
 0x2e7   :  { %v638_v5 = vpop.f32.mrf.mxu0  ;;  %v676_v6 = vpop.f32.mrf.mxu1 }
 0x2e8   :  { %v639_v7 = vadd.f32 %v638_v5, %v637_v2  ;;  %v677_v11 = vadd.f32 %v676_v6, %v675_v3 }
 0x2e9   :  { %v640_v8 = vpop.f32.mrf.mxu0  ;;  %v678_v9 = vpop.f32.mrf.mxu1 }
 0x2ea   :  { %v499_v10 = vadd.f32 %v639_v7, %v604_v4 }
 0x2eb   :  { %v641_v12 = vpop.f32.mrf.mxu0  ;;  %v679_v13 = vpop.f32.mrf.mxu1 }
 0x2ec   :  { %v574_v14 = vadd.f32 %v677_v11, %v499_v10  ;;  %v642_v15 = vadd.f32 %v641_v12, %v640_v8  ;;  %v680_v18 = vadd.f32 %v679_v13, %v678_v9 }
 0x2ee   :  { %582 = vst [vmem:[#allocation8] sm:$0xff] %v574_v14  ;;  %v504_v17 = vadd.f32 %v642_v15, %v604_v4 }
 0x2f0   :  { %v579_v19 = vadd.f32 %v680_v18, %v504_v17 }
 0x2f2   :  { %583 = vst [vmem:[#allocation8 + $0x8] sm:$0xff] %v579_v19 }
 0x2f3   :  { %765 = shalt.err (!%p762_p5)
}
 0x2f4   :  { %595 = dma.vmem_to_hbm [thread:$0]  %s590_s23, 256, %s889_s7, [#allocation4], %s784_s11, %s784_s11, %s785_s12  }
 0x2f5   :  { %778 = dma.done.wait [#allocation4], 256  }
 0x2f6   :  { %779 = vsyncadd [#allocation4], 4294967040 }
 0x2f7   :  { %599 = vsyncpa [#allocation3], 1 }
 0x2f8   :  { %600 = vsyncpa [#allocation6], 1 }
 0x2f9   :  { %601 = vsyncpa [#allocation4], 1 }

</bundles_post_ra>
